<compile_context>
chip_gen: v6e
topology: v6e:2x2x1
jax: 0.10.0
libtpu: 0.0.40
codegen_flags: <defaults>
</compile_context>

<pallas_src>
import jax
import jax.numpy as jnp
import numpy as np
from jax import lax
from jax.experimental import pallas as pl
from jax.experimental.pallas import tpu as pltpu

# Small, module-consistent shapes.
B = 2        # batch
C_IN = 8     # Conv1d in_channels
C_OUT = 16   # Conv1d out_channels == LSTM input_size
T = 8        # sequence length
K = 3        # conv kernel size (padding=1)
H = 32       # LSTM hidden size


def cnn_lstm_kernel(xwin_ref, wconv_ref, bconv_ref, wih_ref, whh_ref, b_ref,
                    wfc_ref, bfc_ref, out_ref, gx_ref):
    """Whole forward pass for the full (tiny) batch in one invocation.

    xwin_ref:  (T*B, K*C_IN)   time-major shifted conv windows (row t*B + b)
    wconv_ref: (K*C_IN, C_OUT) fused conv weight
    bconv_ref: (1, C_OUT)
    wih_ref:   (C_OUT, 4H)     = PyTorch weight_ih_l0.T
    whh_ref:   (H, 4H)         = PyTorch weight_hh_l0.T
    b_ref:     (1, 4H)         = bias_ih_l0 + bias_hh_l0
    wfc_ref:   (H, 1)          = PyTorch fc.weight.T
    bfc_ref:   (1, 1)
    out_ref:   (B, 1)
    gx_ref:    (T*B, 4H)       VMEM scratch: hoisted input projection of the gates
    """
    # ---- Conv1d (3 taps fused into one matmul) + ReLU, batched over B and T ----
    conv = jnp.dot(xwin_ref[...], wconv_ref[...],
                   preferred_element_type=jnp.float32) + bconv_ref[...]   # (T*B, C_OUT)
    conv = jnp.maximum(conv, 0.0)

    # ---- Hoisted input projection: gates_x = conv @ W_ih + (b_ih + b_hh) ----
    gx_ref[...] = jnp.dot(conv, wih_ref[...],
                          preferred_element_type=jnp.float32) + b_ref[...]  # (T*B, 4H)

    # Lane-index mask selecting the 'g' gate lanes [2H, 3H) (tanh); hoisted out of loop.
    lane = lax.broadcasted_iota(jnp.int32, (B, 4 * H), 1)
    g_mask = (lane >= 2 * H) & (lane < 3 * H)

    whh = whh_ref[...]
    h = jnp.zeros((B, H), jnp.float32)
    c = jnp.zeros((B, H), jnp.float32)

    # ---- LSTM recurrence, statically unrolled over T (PyTorch gate order [i,f,g,o]) ----
    for t in range(T):
        gates = gx_ref[t * B:(t + 1) * B, :] + jnp.dot(
            h, whh, preferred_element_type=jnp.float32)                   # (B, 4H)
        # Full-vreg activations (EUP), one select to pick tanh lanes for the g gate.
        act = jnp.where(g_mask, jnp.tanh(gates), jax.nn.sigmoid(gates))   # (B, 4H)
        i_g = act[:, 0:H]
        f_g = act[:, H:2 * H]
        g_g = act[:, 2 * H:3 * H]
        o_g = act[:, 3 * H:4 * H]
        c = f_g * c + i_g * g_g
        h = o_g * jnp.tanh(c)

    # ---- Final Linear(32 -> 1) on the last hidden state, batched over B ----
    out_ref[...] = jnp.dot(h, wfc_ref[...],
                           preferred_element_type=jnp.float32) + bfc_ref[...]


@jax.jit
def cnn_lstm_forward(x, params):
    """x: (B, C_IN, T) in the PyTorch NCW layout; params in PyTorch layouts. Returns (B, 1)."""
    x = x.astype(jnp.float32)

    # Glue: NCW -> (B, T, C_IN), zero-pad time by 1 each side, build shifted windows,
    # and flatten to (T*B, K*C_IN) in time-major order (row index = t*B + b).
    x_btc = jnp.transpose(x, (0, 2, 1))                               # (B, T, C_IN)
    x_pad = jnp.pad(x_btc, ((0, 0), (1, 1), (0, 0)))                  # (B, T+2, C_IN)
    x_win = jnp.concatenate([x_pad[:, k:k + T, :] for k in range(K)],
                            axis=-1)                                  # (B, T, K*C_IN)
    x_win = jnp.transpose(x_win, (1, 0, 2)).reshape(T * B, K * C_IN)  # (T*B, K*C_IN)

    # Re-lay PyTorch parameters into the layouts the kernel consumes.
    wconv = jnp.transpose(params['conv_w'], (2, 1, 0)).reshape(K * C_IN, C_OUT)
    bconv = params['conv_b'].reshape(1, C_OUT)
    wih = params['wih'].T                                             # (C_OUT, 4H)
    whh = params['whh'].T                                             # (H, 4H)
    b = (params['bih'] + params['bhh']).reshape(1, 4 * H)
    wfc = params['wfc'].T                                             # (H, 1)
    bfc = params['bfc'].reshape(1, 1)

    vmem = pl.BlockSpec(memory_space=pltpu.MemorySpace.VMEM)
    return pl.pallas_call(
        cnn_lstm_kernel,
        out_shape=jax.ShapeDtypeStruct((B, 1), jnp.float32),
        in_specs=[vmem] * 8,
        out_specs=pl.BlockSpec(memory_space=pltpu.MemorySpace.VMEM),
        scratch_shapes=[pltpu.VMEM((T * B, 4 * H), jnp.float32)],
    )(x_win, wconv, bconv, wih, whh, b, wfc, bfc)


def init_params(key):
    """Deterministic synthetic parameters in the exact PyTorch shapes."""
    ks = jax.random.split(key, 8)
    scale = 0.1
    return {
        'conv_w': scale * jax.random.normal(ks[0], (C_OUT, C_IN, K), jnp.float32),
        'conv_b': scale * jax.random.normal(ks[1], (C_OUT,), jnp.float32),
        'wih': scale * jax.random.normal(ks[2], (4 * H, C_OUT), jnp.float32),
        'whh': scale * jax.random.normal(ks[3], (4 * H, H), jnp.float32),
        'bih': scale * jax.random.normal(ks[4], (4 * H,), jnp.float32),
        'bhh': scale * jax.random.normal(ks[5], (4 * H,), jnp.float32),
        'wfc': scale * jax.random.normal(ks[6], (1, H), jnp.float32),
        'bfc': scale * jax.random.normal(ks[7], (1,), jnp.float32),
    }


def forward_ref(x, p):
    """Pure-JAX reference emulating the PyTorch module directly on PyTorch-layout params."""
    x = x.astype(jnp.float32)
    xp = jnp.pad(x, ((0, 0), (0, 0), (1, 1)))                          # (B, C_IN, T+2)
    conv = jnp.zeros((B, C_OUT, T), jnp.float32)
    for k in range(K):
        conv = conv + jnp.einsum('bct,oc->bot', xp[:, :, k:k + T], p['conv_w'][:, :, k])
    conv = jnp.maximum(conv + p['conv_b'][None, :, None], 0.0)
    seq = jnp.transpose(conv, (0, 2, 1))                               # (B, T, C_OUT)

    h = jnp.zeros((B, H), jnp.float32)
    c = jnp.zeros((B, H), jnp.float32)
    for t in range(T):
        g = seq[:, t, :] @ p['wih'].T + h @ p['whh'].T + p['bih'] + p['bhh']
        i_g = jax.nn.sigmoid(g[:, 0:H])
        f_g = jax.nn.sigmoid(g[:, H:2 * H])
        g_g = jnp.tanh(g[:, 2 * H:3 * H])
        o_g = jax.nn.sigmoid(g[:, 3 * H:4 * H])
        c = f_g * c + i_g * g_g
        h = o_g * jnp.tanh(c)
    return h @ p['wfc'].T + p['bfc']


if __name__ == "__main__":
    key = jax.random.PRNGKey(0)
    kx, kp = jax.random.split(key)
    x = jax.random.normal(kx, (B, C_IN, T), dtype=jnp.float32)    # PyTorch NCW layout
    params = init_params(kp)

    out = cnn_lstm_forward(x, params)
    out = jax.block_until_ready(out)

    ref = forward_ref(x, params)
    np.testing.assert_allclose(np.asarray(out), np.asarray(ref), rtol=1e-4, atol=1e-4)

    print("KERNEL_OK")
</pallas_src>

<mosaic_0001>
module attributes {stable_mosaic.version = 11 : i64} {
  func.func @cnn_lstm_kernel(%arg0: memref<16x24xf32, #tpu.memory_space<vmem>>, %arg1: memref<24x16xf32, #tpu.memory_space<vmem>>, %arg2: memref<1x16xf32, #tpu.memory_space<vmem>>, %arg3: memref<16x128xf32, #tpu.memory_space<vmem>>, %arg4: memref<32x128xf32, #tpu.memory_space<vmem>>, %arg5: memref<1x128xf32, #tpu.memory_space<vmem>>, %arg6: memref<32x1xf32, #tpu.memory_space<vmem>>, %arg7: memref<1x1xf32, #tpu.memory_space<vmem>>, %arg8: memref<2x1xf32, #tpu.memory_space<vmem>>, %arg9: memref<16x128xf32, #tpu.memory_space<vmem>>) attributes {dimension_semantics = [], scalar_prefetch = 0 : i64, scratch_operands = 1 : i64, tpu.core_type = #tpu.core_type<tc>} {
    %c0 = arith.constant 0 : index
    %c0_0 = arith.constant 0 : index
    %0 = vector.load %arg0[%c0, %c0_0] : memref<16x24xf32, #tpu.memory_space<vmem>>, vector<16x24xf32>
    %c0_1 = arith.constant 0 : index
    %c0_2 = arith.constant 0 : index
    %1 = vector.load %arg1[%c0_1, %c0_2] : memref<24x16xf32, #tpu.memory_space<vmem>>, vector<24x16xf32>
    %cst = arith.constant dense<0.000000e+00> : vector<16x16xf32>
    %2 = tpu.matmul %0, %1, %cst {dimension_numbers = #tpu.dot_dimension_numbers<[1], [0], [0], [1], [0, 0, 1, 1], [], []>} : vector<16x24xf32>, vector<24x16xf32>, vector<16x16xf32> -> vector<16x16xf32>
    %c0_3 = arith.constant 0 : index
    %c0_4 = arith.constant 0 : index
    %3 = vector.load %arg2[%c0_3, %c0_4] : memref<1x16xf32, #tpu.memory_space<vmem>>, vector<1x16xf32>
    %4 = vector.broadcast %3 : vector<1x16xf32> to vector<16x16xf32>
    %5 = arith.addf %2, %4 : vector<16x16xf32>
    %cst_5 = arith.constant 0.000000e+00 : f32
    %6 = vector.broadcast %cst_5 : f32 to vector<16x16xf32>
    %7 = arith.maximumf %5, %6 : vector<16x16xf32>
    %c0_6 = arith.constant 0 : index
    %c0_7 = arith.constant 0 : index
    %8 = vector.load %arg3[%c0_6, %c0_7] : memref<16x128xf32, #tpu.memory_space<vmem>>, vector<16x128xf32>
    %cst_8 = arith.constant dense<0.000000e+00> : vector<16x128xf32>
    %9 = tpu.matmul %7, %8, %cst_8 {dimension_numbers = #tpu.dot_dimension_numbers<[1], [0], [0], [1], [0, 0, 1, 1], [], []>} : vector<16x16xf32>, vector<16x128xf32>, vector<16x128xf32> -> vector<16x128xf32>
    %c0_9 = arith.constant 0 : index
    %c0_10 = arith.constant 0 : index
    %10 = vector.load %arg5[%c0_9, %c0_10] : memref<1x128xf32, #tpu.memory_space<vmem>>, vector<1x128xf32>
    %11 = vector.broadcast %10 : vector<1x128xf32> to vector<16x128xf32>
    %12 = arith.addf %9, %11 : vector<16x128xf32>
    %c0_11 = arith.constant 0 : index
    %c0_12 = arith.constant 0 : index
    %13 = vector.load %arg9[%c0_11, %c0_12] : memref<16x128xf32, #tpu.memory_space<vmem>>, vector<16x128xf32>
    tpu.vector_store %arg9[%c0_11, %c0_12], %12 {strides = array<i32>} : memref<16x128xf32, #tpu.memory_space<vmem>>, vector<16x128xf32>,
    %14 = tpu.iota {dimensions = array<i32: 1>} : vector<2x128xi32>
    %c64_i32 = arith.constant 64 : i32
    %15 = vector.broadcast %c64_i32 : i32 to vector<2x128xi32>
    %16 = arith.cmpi sge, %14, %15 : vector<2x128xi32>
    %c96_i32 = arith.constant 96 : i32
    %17 = vector.broadcast %c96_i32 : i32 to vector<2x128xi32>
    %18 = arith.cmpi slt, %14, %17 : vector<2x128xi32>
    %19 = arith.andi %16, %18 : vector<2x128xi1>
    %c0_13 = arith.constant 0 : index
    %c0_14 = arith.constant 0 : index
    %20 = vector.load %arg4[%c0_13, %c0_14] : memref<32x128xf32, #tpu.memory_space<vmem>>, vector<32x128xf32>
    %cst_15 = arith.constant 0.000000e+00 : f32
    %21 = vector.broadcast %cst_15 : f32 to vector<2x32xf32>
    %cst_16 = arith.constant 0.000000e+00 : f32
    %22 = vector.broadcast %cst_16 : f32 to vector<2x32xf32>
    %c0_17 = arith.constant 0 : index
    %c0_18 = arith.constant 0 : index
    %23 = vector.load %arg9[%c0_17, %c0_18] : memref<16x128xf32, #tpu.memory_space<vmem>>, vector<2x128xf32>
    %cst_19 = arith.constant dense<0.000000e+00> : vector<2x128xf32>
    %24 = tpu.matmul %21, %20, %cst_19 {dimension_numbers = #tpu.dot_dimension_numbers<[1], [0], [0], [1], [0, 0, 1, 1], [], []>} : vector<2x32xf32>, vector<32x128xf32>, vector<2x128xf32> -> vector<2x128xf32>
    %25 = arith.addf %23, %24 : vector<2x128xf32>
    %26 = math.tanh %25 : vector<2x128xf32>
    %27 = arith.negf %25 : vector<2x128xf32>
    %28 = math.exp %27 : vector<2x128xf32>
    %cst_20 = arith.constant 1.000000e+00 : f32
    %29 = vector.broadcast %cst_20 : f32 to vector<2x128xf32>
    %30 = arith.addf %29, %28 : vector<2x128xf32>
    %31 = arith.divf %29, %30 : vector<2x128xf32>
    %32 = arith.select %19, %26, %31 : vector<2x128xi1>, vector<2x128xf32>
    %33 = vector.extract_strided_slice %32 {offsets = [0, 0], sizes = [2, 32], strides = [1, 1]} : vector<2x128xf32> to vector<2x32xf32>
    %34 = vector.extract_strided_slice %32 {offsets = [0, 32], sizes = [2, 32], strides = [1, 1]} : vector<2x128xf32> to vector<2x32xf32>
    %35 = vector.extract_strided_slice %32 {offsets = [0, 64], sizes = [2, 32], strides = [1, 1]} : vector<2x128xf32> to vector<2x32xf32>
    %36 = vector.extract_strided_slice %32 {offsets = [0, 96], sizes = [2, 32], strides = [1, 1]} : vector<2x128xf32> to vector<2x32xf32>
    %37 = arith.mulf %34, %22 : vector<2x32xf32>
    %38 = arith.mulf %33, %35 : vector<2x32xf32>
    %39 = arith.addf %37, %38 : vector<2x32xf32>
    %40 = math.tanh %39 : vector<2x32xf32>
    %41 = arith.mulf %36, %40 : vector<2x32xf32>
    %c2 = arith.constant 2 : index
    %c0_21 = arith.constant 0 : index
    %42 = vector.load %arg9[%c2, %c0_21] : memref<16x128xf32, #tpu.memory_space<vmem>>, vector<2x128xf32>
    %cst_22 = arith.constant dense<0.000000e+00> : vector<2x128xf32>
    %43 = tpu.matmul %41, %20, %cst_22 {dimension_numbers = #tpu.dot_dimension_numbers<[1], [0], [0], [1], [0, 0, 1, 1], [], []>} : vector<2x32xf32>, vector<32x128xf32>, vector<2x128xf32> -> vector<2x128xf32>
    %44 = arith.addf %42, %43 : vector<2x128xf32>
    %45 = math.tanh %44 : vector<2x128xf32>
    %46 = arith.negf %44 : vector<2x128xf32>
    %47 = math.exp %46 : vector<2x128xf32>
    %cst_23 = arith.constant 1.000000e+00 : f32
    %48 = vector.broadcast %cst_23 : f32 to vector<2x128xf32>
    %49 = arith.addf %48, %47 : vector<2x128xf32>
    %50 = arith.divf %48, %49 : vector<2x128xf32>
    %51 = arith.select %19, %45, %50 : vector<2x128xi1>, vector<2x128xf32>
    %52 = vector.extract_strided_slice %51 {offsets = [0, 0], sizes = [2, 32], strides = [1, 1]} : vector<2x128xf32> to vector<2x32xf32>
    %53 = vector.extract_strided_slice %51 {offsets = [0, 32], sizes = [2, 32], strides = [1, 1]} : vector<2x128xf32> to vector<2x32xf32>
    %54 = vector.extract_strided_slice %51 {offsets = [0, 64], sizes = [2, 32], strides = [1, 1]} : vector<2x128xf32> to vector<2x32xf32>
    %55 = vector.extract_strided_slice %51 {offsets = [0, 96], sizes = [2, 32], strides = [1, 1]} : vector<2x128xf32> to vector<2x32xf32>
    %56 = arith.mulf %53, %39 : vector<2x32xf32>
    %57 = arith.mulf %52, %54 : vector<2x32xf32>
    %58 = arith.addf %56, %57 : vector<2x32xf32>
    %59 = math.tanh %58 : vector<2x32xf32>
    %60 = arith.mulf %55, %59 : vector<2x32xf32>
    %c4 = arith.constant 4 : index
    %c0_24 = arith.constant 0 : index
    %61 = vector.load %arg9[%c4, %c0_24] : memref<16x128xf32, #tpu.memory_space<vmem>>, vector<2x128xf32>
    %cst_25 = arith.constant dense<0.000000e+00> : vector<2x128xf32>
    %62 = tpu.matmul %60, %20, %cst_25 {dimension_numbers = #tpu.dot_dimension_numbers<[1], [0], [0], [1], [0, 0, 1, 1], [], []>} : vector<2x32xf32>, vector<32x128xf32>, vector<2x128xf32> -> vector<2x128xf32>
    %63 = arith.addf %61, %62 : vector<2x128xf32>
    %64 = math.tanh %63 : vector<2x128xf32>
    %65 = arith.negf %63 : vector<2x128xf32>
    %66 = math.exp %65 : vector<2x128xf32>
    %cst_26 = arith.constant 1.000000e+00 : f32
    %67 = vector.broadcast %cst_26 : f32 to vector<2x128xf32>
    %68 = arith.addf %67, %66 : vector<2x128xf32>
    %69 = arith.divf %67, %68 : vector<2x128xf32>
    %70 = arith.select %19, %64, %69 : vector<2x128xi1>, vector<2x128xf32>
    %71 = vector.extract_strided_slice %70 {offsets = [0, 0], sizes = [2, 32], strides = [1, 1]} : vector<2x128xf32> to vector<2x32xf32>
    %72 = vector.extract_strided_slice %70 {offsets = [0, 32], sizes = [2, 32], strides = [1, 1]} : vector<2x128xf32> to vector<2x32xf32>
    %73 = vector.extract_strided_slice %70 {offsets = [0, 64], sizes = [2, 32], strides = [1, 1]} : vector<2x128xf32> to vector<2x32xf32>
    %74 = vector.extract_strided_slice %70 {offsets = [0, 96], sizes = [2, 32], strides = [1, 1]} : vector<2x128xf32> to vector<2x32xf32>
    %75 = arith.mulf %72, %58 : vector<2x32xf32>
    %76 = arith.mulf %71, %73 : vector<2x32xf32>
    %77 = arith.addf %75, %76 : vector<2x32xf32>
    %78 = math.tanh %77 : vector<2x32xf32>
    %79 = arith.mulf %74, %78 : vector<2x32xf32>
    %c6 = arith.constant 6 : index
    %c0_27 = arith.constant 0 : index
    %80 = vector.load %arg9[%c6, %c0_27] : memref<16x128xf32, #tpu.memory_space<vmem>>, vector<2x128xf32>
    %cst_28 = arith.constant dense<0.000000e+00> : vector<2x128xf32>
    %81 = tpu.matmul %79, %20, %cst_28 {dimension_numbers = #tpu.dot_dimension_numbers<[1], [0], [0], [1], [0, 0, 1, 1], [], []>} : vector<2x32xf32>, vector<32x128xf32>, vector<2x128xf32> -> vector<2x128xf32>
    %82 = arith.addf %80, %81 : vector<2x128xf32>
    %83 = math.tanh %82 : vector<2x128xf32>
    %84 = arith.negf %82 : vector<2x128xf32>
    %85 = math.exp %84 : vector<2x128xf32>
    %cst_29 = arith.constant 1.000000e+00 : f32
    %86 = vector.broadcast %cst_29 : f32 to vector<2x128xf32>
    %87 = arith.addf %86, %85 : vector<2x128xf32>
    %88 = arith.divf %86, %87 : vector<2x128xf32>
    %89 = arith.select %19, %83, %88 : vector<2x128xi1>, vector<2x128xf32>
    %90 = vector.extract_strided_slice %89 {offsets = [0, 0], sizes = [2, 32], strides = [1, 1]} : vector<2x128xf32> to vector<2x32xf32>
    %91 = vector.extract_strided_slice %89 {offsets = [0, 32], sizes = [2, 32], strides = [1, 1]} : vector<2x128xf32> to vector<2x32xf32>
    %92 = vector.extract_strided_slice %89 {offsets = [0, 64], sizes = [2, 32], strides = [1, 1]} : vector<2x128xf32> to vector<2x32xf32>
    %93 = vector.extract_strided_slice %89 {offsets = [0, 96], sizes = [2, 32], strides = [1, 1]} : vector<2x128xf32> to vector<2x32xf32>
    %94 = arith.mulf %91, %77 : vector<2x32xf32>
    %95 = arith.mulf %90, %92 : vector<2x32xf32>
    %96 = arith.addf %94, %95 : vector<2x32xf32>
    %97 = math.tanh %96 : vector<2x32xf32>
    %98 = arith.mulf %93, %97 : vector<2x32xf32>
    %c8 = arith.constant 8 : index
    %c0_30 = arith.constant 0 : index
    %99 = vector.load %arg9[%c8, %c0_30] : memref<16x128xf32, #tpu.memory_space<vmem>>, vector<2x128xf32>
    %cst_31 = arith.constant dense<0.000000e+00> : vector<2x128xf32>
    %100 = tpu.matmul %98, %20, %cst_31 {dimension_numbers = #tpu.dot_dimension_numbers<[1], [0], [0], [1], [0, 0, 1, 1], [], []>} : vector<2x32xf32>, vector<32x128xf32>, vector<2x128xf32> -> vector<2x128xf32>
    %101 = arith.addf %99, %100 : vector<2x128xf32>
    %102 = math.tanh %101 : vector<2x128xf32>
    %103 = arith.negf %101 : vector<2x128xf32>
    %104 = math.exp %103 : vector<2x128xf32>
    %cst_32 = arith.constant 1.000000e+00 : f32
    %105 = vector.broadcast %cst_32 : f32 to vector<2x128xf32>
    %106 = arith.addf %105, %104 : vector<2x128xf32>
    %107 = arith.divf %105, %106 : vector<2x128xf32>
    %108 = arith.select %19, %102, %107 : vector<2x128xi1>, vector<2x128xf32>
    %109 = vector.extract_strided_slice %108 {offsets = [0, 0], sizes = [2, 32], strides = [1, 1]} : vector<2x128xf32> to vector<2x32xf32>
    %110 = vector.extract_strided_slice %108 {offsets = [0, 32], sizes = [2, 32], strides = [1, 1]} : vector<2x128xf32> to vector<2x32xf32>
    %111 = vector.extract_strided_slice %108 {offsets = [0, 64], sizes = [2, 32], strides = [1, 1]} : vector<2x128xf32> to vector<2x32xf32>
    %112 = vector.extract_strided_slice %108 {offsets = [0, 96], sizes = [2, 32], strides = [1, 1]} : vector<2x128xf32> to vector<2x32xf32>
    %113 = arith.mulf %110, %96 : vector<2x32xf32>
    %114 = arith.mulf %109, %111 : vector<2x32xf32>
    %115 = arith.addf %113, %114 : vector<2x32xf32>
    %116 = math.tanh %115 : vector<2x32xf32>
    %117 = arith.mulf %112, %116 : vector<2x32xf32>
    %c10 = arith.constant 10 : index
    %c0_33 = arith.constant 0 : index
    %118 = vector.load %arg9[%c10, %c0_33] : memref<16x128xf32, #tpu.memory_space<vmem>>, vector<2x128xf32>
    %cst_34 = arith.constant dense<0.000000e+00> : vector<2x128xf32>
    %119 = tpu.matmul %117, %20, %cst_34 {dimension_numbers = #tpu.dot_dimension_numbers<[1], [0], [0], [1], [0, 0, 1, 1], [], []>} : vector<2x32xf32>, vector<32x128xf32>, vector<2x128xf32> -> vector<2x128xf32>
    %120 = arith.addf %118, %119 : vector<2x128xf32>
    %121 = math.tanh %120 : vector<2x128xf32>
    %122 = arith.negf %120 : vector<2x128xf32>
    %123 = math.exp %122 : vector<2x128xf32>
    %cst_35 = arith.constant 1.000000e+00 : f32
    %124 = vector.broadcast %cst_35 : f32 to vector<2x128xf32>
    %125 = arith.addf %124, %123 : vector<2x128xf32>
    %126 = arith.divf %124, %125 : vector<2x128xf32>
    %127 = arith.select %19, %121, %126 : vector<2x128xi1>, vector<2x128xf32>
    %128 = vector.extract_strided_slice %127 {offsets = [0, 0], sizes = [2, 32], strides = [1, 1]} : vector<2x128xf32> to vector<2x32xf32>
    %129 = vector.extract_strided_slice %127 {offsets = [0, 32], sizes = [2, 32], strides = [1, 1]} : vector<2x128xf32> to vector<2x32xf32>
    %130 = vector.extract_strided_slice %127 {offsets = [0, 64], sizes = [2, 32], strides = [1, 1]} : vector<2x128xf32> to vector<2x32xf32>
    %131 = vector.extract_strided_slice %127 {offsets = [0, 96], sizes = [2, 32], strides = [1, 1]} : vector<2x128xf32> to vector<2x32xf32>
    %132 = arith.mulf %129, %115 : vector<2x32xf32>
    %133 = arith.mulf %128, %130 : vector<2x32xf32>
    %134 = arith.addf %132, %133 : vector<2x32xf32>
    %135 = math.tanh %134 : vector<2x32xf32>
    %136 = arith.mulf %131, %135 : vector<2x32xf32>
    %c12 = arith.constant 12 : index
    %c0_36 = arith.constant 0 : index
    %137 = vector.load %arg9[%c12, %c0_36] : memref<16x128xf32, #tpu.memory_space<vmem>>, vector<2x128xf32>
    %cst_37 = arith.constant dense<0.000000e+00> : vector<2x128xf32>
    %138 = tpu.matmul %136, %20, %cst_37 {dimension_numbers = #tpu.dot_dimension_numbers<[1], [0], [0], [1], [0, 0, 1, 1], [], []>} : vector<2x32xf32>, vector<32x128xf32>, vector<2x128xf32> -> vector<2x128xf32>
    %139 = arith.addf %137, %138 : vector<2x128xf32>
    %140 = math.tanh %139 : vector<2x128xf32>
    %141 = arith.negf %139 : vector<2x128xf32>
    %142 = math.exp %141 : vector<2x128xf32>
    %cst_38 = arith.constant 1.000000e+00 : f32
    %143 = vector.broadcast %cst_38 : f32 to vector<2x128xf32>
    %144 = arith.addf %143, %142 : vector<2x128xf32>
    %145 = arith.divf %143, %144 : vector<2x128xf32>
    %146 = arith.select %19, %140, %145 : vector<2x128xi1>, vector<2x128xf32>
    %147 = vector.extract_strided_slice %146 {offsets = [0, 0], sizes = [2, 32], strides = [1, 1]} : vector<2x128xf32> to vector<2x32xf32>
    %148 = vector.extract_strided_slice %146 {offsets = [0, 32], sizes = [2, 32], strides = [1, 1]} : vector<2x128xf32> to vector<2x32xf32>
    %149 = vector.extract_strided_slice %146 {offsets = [0, 64], sizes = [2, 32], strides = [1, 1]} : vector<2x128xf32> to vector<2x32xf32>
    %150 = vector.extract_strided_slice %146 {offsets = [0, 96], sizes = [2, 32], strides = [1, 1]} : vector<2x128xf32> to vector<2x32xf32>
    %151 = arith.mulf %148, %134 : vector<2x32xf32>
    %152 = arith.mulf %147, %149 : vector<2x32xf32>
    %153 = arith.addf %151, %152 : vector<2x32xf32>
    %154 = math.tanh %153 : vector<2x32xf32>
    %155 = arith.mulf %150, %154 : vector<2x32xf32>
    %c14 = arith.constant 14 : index
    %c0_39 = arith.constant 0 : index
    %156 = vector.load %arg9[%c14, %c0_39] : memref<16x128xf32, #tpu.memory_space<vmem>>, vector<2x128xf32>
    %cst_40 = arith.constant dense<0.000000e+00> : vector<2x128xf32>
    %157 = tpu.matmul %155, %20, %cst_40 {dimension_numbers = #tpu.dot_dimension_numbers<[1], [0], [0], [1], [0, 0, 1, 1], [], []>} : vector<2x32xf32>, vector<32x128xf32>, vector<2x128xf32> -> vector<2x128xf32>
    %158 = arith.addf %156, %157 : vector<2x128xf32>
    %159 = math.tanh %158 : vector<2x128xf32>
    %160 = arith.negf %158 : vector<2x128xf32>
    %161 = math.exp %160 : vector<2x128xf32>
    %cst_41 = arith.constant 1.000000e+00 : f32
    %162 = vector.broadcast %cst_41 : f32 to vector<2x128xf32>
    %163 = arith.addf %162, %161 : vector<2x128xf32>
    %164 = arith.divf %162, %163 : vector<2x128xf32>
    %165 = arith.select %19, %159, %164 : vector<2x128xi1>, vector<2x128xf32>
    %166 = vector.extract_strided_slice %165 {offsets = [0, 0], sizes = [2, 32], strides = [1, 1]} : vector<2x128xf32> to vector<2x32xf32>
    %167 = vector.extract_strided_slice %165 {offsets = [0, 32], sizes = [2, 32], strides = [1, 1]} : vector<2x128xf32> to vector<2x32xf32>
    %168 = vector.extract_strided_slice %165 {offsets = [0, 64], sizes = [2, 32], strides = [1, 1]} : vector<2x128xf32> to vector<2x32xf32>
    %169 = vector.extract_strided_slice %165 {offsets = [0, 96], sizes = [2, 32], strides = [1, 1]} : vector<2x128xf32> to vector<2x32xf32>
    %170 = arith.mulf %167, %153 : vector<2x32xf32>
    %171 = arith.mulf %166, %168 : vector<2x32xf32>
    %172 = arith.addf %170, %171 : vector<2x32xf32>
    %173 = math.tanh %172 : vector<2x32xf32>
    %174 = arith.mulf %169, %173 : vector<2x32xf32>
    %c0_42 = arith.constant 0 : index
    %c0_43 = arith.constant 0 : index
    %175 = vector.load %arg6[%c0_42, %c0_43] : memref<32x1xf32, #tpu.memory_space<vmem>>, vector<32x1xf32>
    %cst_44 = arith.constant dense<0.000000e+00> : vector<2x1xf32>
    %176 = tpu.matmul %174, %175, %cst_44 {dimension_numbers = #tpu.dot_dimension_numbers<[1], [0], [0], [1], [0, 0, 1, 1], [], []>} : vector<2x32xf32>, vector<32x1xf32>, vector<2x1xf32> -> vector<2x1xf32>
    %c0_45 = arith.constant 0 : index
    %c0_46 = arith.constant 0 : index
    %177 = vector.load %arg7[%c0_45, %c0_46] : memref<1x1xf32, #tpu.memory_space<vmem>>, vector<1x1xf32>
    %178 = vector.broadcast %177 : vector<1x1xf32> to vector<2x1xf32>
    %179 = arith.addf %176, %178 : vector<2x1xf32>
    %c0_47 = arith.constant 0 : index
    %c0_48 = arith.constant 0 : index
    %180 = vector.load %arg8[%c0_47, %c0_48] : memref<2x1xf32, #tpu.memory_space<vmem>>, vector<2x1xf32>
    tpu.vector_store %arg8[%c0_47, %c0_48], %179 {strides = array<i32>} : memref<2x1xf32, #tpu.memory_space<vmem>>, vector<2x1xf32>,
    return
  }
}

</mosaic_0001>

<bundles_post_ra>
// kernel: cnn_lstm_forward.1
= control target key start
LH: loop header
LB: loop body
LE: loop exit
PB: predicated region body
PF: predicated region fallthrough
CT: control target
= control target key end

     0   :  { %vm43_vm0 = vcmask 195584   ;;  %v1396_v7 = vmov 0.0   ;;  %vm1397_vm1 = vmmov 0   ;;  %vm136_vm2 = vcmask 130048   ;;  %s1399_s26 = smov 32   ;;  %s1657_s1 = inlined_call_operand.vmem [shape: f32[24,16], index: 1, kind: input, shape index: {}]   ;;  %s1658_s0 = inlined_call_operand.vmem [shape: f32[16,24], index: 0, kind: input, shape index: {}]   ;;  %s1659_s3 = inlined_call_operand.vmem [shape: f32[16,128], index: 3, kind: input, shape index: {}]   ;;  %s1660_s4 = inlined_call_operand.vmem [shape: f32[32,128], index: 4, kind: input, shape index: {}]   ;;  %s1661_s2 = inlined_call_operand.vmem [shape: f32[1,16], index: 2, kind: input, shape index: {}]   ;;  %s1662_s5 = inlined_call_operand.vmem [shape: f32[1,128], index: 5, kind: input, shape index: {}]   ;;  %s1663_s6 = inlined_call_operand.vmem [shape: f32[32,1], index: 6, kind: input, shape index: {}]   ;;  %s1664_s7 = inlined_call_operand.<no memory space> [shape: f32[1,1], index: 7, kind: input, shape index: {}]   ;;  %s1665_s8 = inlined_call_operand.vmem [shape: f32[2,1], index: 8, kind: output, shape index: {}]  }
   0x1   :  { %v35_v0 = vld [vmem:[%s1657_s1 + $0x10] sm:$0xff]  ;;  %v34_v1 = vld [vmem:[%s1657_s1 + $0x8] sm:$0xff]  ;;  %v31_v2 = vld [vmem:[%s1658_s0] sm:$0xff]  ;;  %1229 = vmatprep.subr.mxu1 %v1396_v7  ;;  %1237 = vmatprep.mubr.msk.f32.mxu1 %vm1397_vm1, %v1396_v7  ;;  %v220_v31 = vlaneseq  ;;  %vm230_vm6 = vcmask 261120   ;;  %vm1130_vm7 = vcmask 1024  }
   0x2   :  { %1213 = vmatprep.subr.mxu0 %v35_v0  ;;  %v33_v3 = vld [vmem:[%s1657_s1] sm:$0xff]  ;;  %1219 = vmatprep.mubr.msk.f32.mxu0 %vm43_vm0, %v31_v2  ;;  %v32_v4 = vld [vmem:[%s1658_s0 + $0x8] sm:$0xff]  ;;  %v1470_v8 = vld [vmem:[%s1660_s4 + $0x18] sm:$0xff] }
   0x3   :  { %1214 = vmatpush3.msra.mxu0 %v35_v0  ;;  %v128_v5 = vld [vmem:[%s1659_s3 + $0x8] sm:$0xff]  ;;  %v127_v6 = vld [vmem:[%s1659_s3] sm:$0xff]  ;;  %v1475_v9 = vld [vmem:[%s1660_s4 + $0x10] sm:$0xff]  ;;  %1230 = vmatpush3.msra.mxu1 %v1470_v8  ;;  %v221_v32 = vand.u32 127, %v220_v31 }
   0x4   :  { %1215 = vmatprep.subr.mxu0 %v34_v1  ;;  %1231 = vmatprep.subr.mxu1 %v1396_v7  ;;  %v1485_v10 = vld [vmem:[%s1660_s4 + $0x8] sm:$0xff]  ;;  %v1492_v11 = vld [vmem:[%s1660_s4] sm:$0xff] }
   0x5   :  { %1216 = vmatpush3.msra.mxu0 %v34_v1  ;;  %1232 = vmatpush3.msra.mxu1 %v1475_v9  ;;  %v1136_v12 = vld [vmem:[%s1661_s2] ss:$0 sm:$0xff]  ;;  %vm222_vm3 = vcmp.ge.s32.totalorder %v221_v32, 64  ;;  %vm223_vm4 = vcmp.lt.s32.totalorder %v221_v32, 96  ;;  %v1045_v33 = vld [vmem:[%s1663_s6 + $0x8] sm:$0xff] }
   0x6   :  { %1217 = vmatprep.subr.mxu0 %v33_v3  ;;  %1233 = vmatprep.subr.mxu1 %v1396_v7  ;;  %v1139_v21 = vld [vmem:[%s1662_s5] ss:$0 sm:$0xff]  ;;  %vm1525_vm5 = vmand %vm222_vm3, %vm223_vm4  ;;  %s1398_s5 = smov 64  }
   0x7   :  { %1218 = vmatpush3.msra.mxu0 %v33_v3  ;;  %1234 = vmatpush3.msra.mxu1 %v1485_v10 }
   0x8   :  { %1220 = vmatmul.mubr.msk.f32.vlgmr.msra.gmra.mxu0 %vm43_vm0, %v32_v4  ;;  %1222 = vmatprep.subr.mxu0 %v128_v5 }
   0x9   :  { %1223 = vmatpush3.msra.mxu0 %v128_v5  ;;  %1235 = vmatprep.subr.mxu1 %v1396_v7 }
   0xa   :  { %1224 = vmatprep.subr.mxu0 %v127_v6  ;;  %1236 = vmatpush3.msra.mxu1 %v1492_v11 }
   0xb   :  { %1225 = vmatpush3.msra.mxu0 %v127_v6  ;;  %1238 = vmatmul.mubr.f32.vlgmr.msra.gmra.mxu1 %v1396_v7 }
   0xc   :  { %1240 = vmatprep.subr.mxu0 %v1396_v7  ;;  %1251 = vmatprep.subr.mxu1 %v1396_v7 }
   0xd   :  { %1252 = vmatpush3.msra.mxu1 %v1470_v8  ;;  %1259 = vmatprep.mubr.msk.f32.mxu1 %vm1397_vm1, %v1396_v7 }
   0xe   :  { %1253 = vmatprep.subr.mxu1 %v1396_v7 }
   0xf   :  { %1254 = vmatpush3.msra.mxu1 %v1475_v9 }
  0x10   :  { %1255 = vmatprep.subr.mxu1 %v1396_v7 }
  0x11   :  { %1256 = vmatpush3.msra.mxu1 %v1485_v10 }
  0x12   :  { %1257 = vmatprep.subr.mxu1 %v1396_v7 }
  0x13   :  { %1258 = vmatpush3.msra.mxu1 %v1492_v11 }
  0x14   :  { %1273 = vmatprep.subr.mxu1 %v1396_v7 }
  0xc8   :  { %v1221_v13 = vpop.f32.mrf.mxu0 }
  0xc9   :  { %v122_v14 = vadd.f32 %v1221_v13, %v1136_v12 }
  0xca   :  { %v116_v15 = vpop.f32.mrf.mxu0 }
  0xcb   :  { %v117_v16 = vadd.f32 %v1136_v12, %v116_v15  ;;  %v126_v18 = vmax.f32 %v122_v14, 0.0  ;;  %v300_v19 = vpop.f32.mrf.mxu1 }
  0xcd   :  { %v125_v17 = vmax.f32 %v117_v16, 0.0  ;;  %v1239_v20 = vpop.f32.mrf.mxu1 }
  0xcf   :  { %1226 = vmatprep.mubr.msk.f32.mxu0 %vm136_vm2, %v125_v17 }
  0xd0   :  { %1227 = vmatmul.mubr.msk.f32.vlgmr.msra.gmra.mxu0 %vm136_vm2, %v126_v18 }
  0xd1   :  { %1241 = vmatpush3.msra.mxu0 %v1470_v8  ;;  %1248 = vmatprep.mubr.msk.f32.mxu0 %vm1397_vm1, %v1396_v7 }
  0xd2   :  { %1242 = vmatprep.subr.mxu0 %v1396_v7 }
  0xd3   :  { %1243 = vmatpush3.msra.mxu0 %v1475_v9 }
  0xd4   :  { %1244 = vmatprep.subr.mxu0 %v1396_v7 }
  0xd5   :  { %1245 = vmatpush3.msra.mxu0 %v1485_v10 }
  0xd6   :  { %1246 = vmatprep.subr.mxu0 %v1396_v7 }
  0xd7   :  { %1247 = vmatpush3.msra.mxu0 %v1492_v11 }
  0xd8   :  { %1262 = vmatprep.subr.mxu0 %v1396_v7 }
 0x190   :  { %v1228_v22 = vpop.f32.mrf.mxu0 }
 0x191   :  { %v215_v23 = vadd.f32 %v1228_v22, %v1139_v21 }
 0x192   :  { %v209_v24 = vpop.f32.mrf.mxu0 }
 0x193   :  { %219 = vst [vmem:[#allocation2 + $0x8] sm:$0xff] %v215_v23  ;;  %v210_v25 = vadd.f32 %v1139_v21, %v209_v24 }
 0x195   :  { %218 = vst [vmem:[#allocation2] sm:$0xff] %v210_v25 }
 0x19c   :  { %v229_v26 = vld [vmem:[#allocation2] sm:$0x3]  ;;  %v330_v46 = vld [vmem:[#allocation2 + $0x2] sm:$0x3]  ;;  %v432_v1 = vld [vmem:[#allocation2 + $0x4] sm:$0x3] }
 0x19d   :  { %v304_v27 = vadd.f32 %v300_v19, %v229_v26  ;;  %v534_v25 = vld [vmem:[#allocation2 + $0x6] sm:$0x3] }
 0x19f   :  { %v1142_v28 = vmul.f32 -1.442695, %v304_v27 }
 0x1a1   :  { %1332 = vpow2.f32 %v1142_v28 }
 0x1a2   :  { %1334 = vtanh.f32 %v304_v27 }
 0x1ae   :  { %v1333_v29 = vpop.eup %1332 }
 0x1af   :  { %v309_v30 = vadd.f32 1.0, %v1333_v29  ;;  %v1335_v34 = vpop.eup %1334 }
 0x1b1   :  { %1336 = vrcp.f32 %v309_v30 }
 0x1be   :  { %v1337_v35 = vpop.eup %1336 }
 0x1bf   :  { %v312_v36 = vsel %vm1525_vm5, %v1335_v34, %v1337_v35 }
 0x1c0   :  { %315 = vrot.lane.b32.xlu0 %v312_v36, %s1398_s5  ;;  %v313_v39 = vmul.f32 0.0, %v312_v36 }
 0x232   :  { %v316_v37 = vpop.permute.xlu0 %315 }
 0x233   :  { %v318_v38 = vmul.f32 %v316_v37, %v312_v36 }
 0x235   :  { %320 = vrot.lane.b32.xlu0 %v318_v38, %s1399_s26 }
 0x2a7   :  { %v321_v40 = vpop.permute.xlu0 %320 }
 0x2a8   :  { %v323_v41 = vadd.f32 %v321_v40, %v313_v39 }
 0x2aa   :  { %1338 = vtanh.f32 %v323_v41 }
 0x2b7   :  { %v1339_v42 = vpop.eup %1338 }
 0x2b8   :  { %326 = vrot.lane.b32.xlu1 %v1339_v42, %s1398_s5 }
 0x32a   :  { %v327_v43 = vpop.permute.xlu1 %326 }
 0x32b   :  { %v329_v44 = vmul.f32 %v327_v43, %v312_v36 }
 0x32d   :  { %332 = vrot.lane.b32.xlu1 %v329_v44, %s1399_s26 }
 0x39f   :  { %v333_v45 = vpop.permute.xlu1 %332 }
 0x3a0   :  { %1249 = vmatmul.mubr.msk.f32.vlgmr.msra.gmra.mxu0 %vm230_vm6, %v333_v45  ;;  %v636_v45 = vld [vmem:[#allocation2 + $0x8] sm:$0x3] }
 0x3a1   :  { %1263 = vmatpush3.msra.mxu0 %v1470_v8  ;;  %1270 = vmatprep.mubr.msk.f32.mxu0 %vm1397_vm1, %v1396_v7 }
 0x3a2   :  { %1264 = vmatprep.subr.mxu0 %v1396_v7 }
 0x3a3   :  { %1265 = vmatpush3.msra.mxu0 %v1475_v9 }
 0x3a4   :  { %1266 = vmatprep.subr.mxu0 %v1396_v7 }
 0x3a5   :  { %1267 = vmatpush3.msra.mxu0 %v1485_v10 }
 0x3a6   :  { %1268 = vmatprep.subr.mxu0 %v1396_v7 }
 0x3a7   :  { %1269 = vmatpush3.msra.mxu0 %v1492_v11 }
 0x3a8   :  { %1284 = vmatprep.subr.mxu0 %v1396_v7 }
 0x460   :  { %v402_v47 = vpop.f32.mrf.mxu0 }
 0x461   :  { %v406_v48 = vadd.f32 %v402_v47, %v330_v46 }
 0x462   :  { %v1250_v49 = vpop.f32.mrf.mxu0 }
 0x463   :  { %v1144_v50 = vmul.f32 -1.442695, %v406_v48 }
 0x465   :  { %1340 = vpow2.f32 %v1144_v50 }
 0x466   :  { %1342 = vtanh.f32 %v406_v48 }
 0x472   :  { %v1341_v51 = vpop.eup %1340 }
 0x473   :  { %v411_v52 = vadd.f32 1.0, %v1341_v51  ;;  %v1343_v53 = vpop.eup %1342 }
 0x475   :  { %1344 = vrcp.f32 %v411_v52 }
 0x482   :  { %v1345_v54 = vpop.eup %1344 }
 0x483   :  { %v414_v55 = vsel %vm1525_vm5, %v1343_v53, %v1345_v54 }
 0x484   :  { %417 = vrot.lane.b32.xlu0 %v414_v55, %s1398_s5  ;;  %v415_v58 = vmul.f32 %v414_v55, %v323_v41 }
 0x4f6   :  { %v418_v56 = vpop.permute.xlu0 %417 }
 0x4f7   :  { %v420_v57 = vmul.f32 %v418_v56, %v414_v55 }
 0x4f9   :  { %422 = vrot.lane.b32.xlu1 %v420_v57, %s1399_s26 }
 0x56b   :  { %v423_v59 = vpop.permute.xlu1 %422 }
 0x56c   :  { %v425_v60 = vadd.f32 %v423_v59, %v415_v58 }
 0x56e   :  { %1346 = vtanh.f32 %v425_v60 }
 0x57b   :  { %v1347_v61 = vpop.eup %1346 }
 0x57c   :  { %428 = vrot.lane.b32.xlu0 %v1347_v61, %s1398_s5 }
 0x5ee   :  { %v429_v62 = vpop.permute.xlu0 %428 }
 0x5ef   :  { %v431_v63 = vmul.f32 %v429_v62, %v414_v55 }
 0x5f1   :  { %434 = vrot.lane.b32.xlu1 %v431_v63, %s1399_s26 }
 0x663   :  { %v435_v0 = vpop.permute.xlu1 %434 }
 0x664   :  { %1260 = vmatmul.mubr.msk.f32.vlgmr.msra.gmra.mxu1 %vm230_vm6, %v435_v0  ;;  %v738_v0 = vld [vmem:[#allocation2 + $0xa] sm:$0x3] }
 0x665   :  { %1274 = vmatpush3.msra.mxu1 %v1470_v8  ;;  %1281 = vmatprep.mubr.msk.f32.mxu1 %vm1397_vm1, %v1396_v7 }
 0x666   :  { %1275 = vmatprep.subr.mxu1 %v1396_v7 }
 0x667   :  { %1276 = vmatpush3.msra.mxu1 %v1475_v9 }
 0x668   :  { %1277 = vmatprep.subr.mxu1 %v1396_v7 }
 0x669   :  { %1278 = vmatpush3.msra.mxu1 %v1485_v10 }
 0x66a   :  { %1279 = vmatprep.subr.mxu1 %v1396_v7 }
 0x66b   :  { %1280 = vmatpush3.msra.mxu1 %v1492_v11 }
 0x66c   :  { %1295 = vmatprep.subr.mxu1 %v1396_v7 }
 0x724   :  { %v504_v2 = vpop.f32.mrf.mxu1 }
 0x725   :  { %v508_v3 = vadd.f32 %v504_v2, %v432_v1 }
 0x726   :  { %v1261_v4 = vpop.f32.mrf.mxu1 }
 0x727   :  { %v1146_v5 = vmul.f32 -1.442695, %v508_v3 }
 0x729   :  { %1348 = vpow2.f32 %v1146_v5 }
 0x72a   :  { %1350 = vtanh.f32 %v508_v3 }
 0x736   :  { %v1349_v6 = vpop.eup %1348 }
 0x737   :  { %v513_v12 = vadd.f32 1.0, %v1349_v6  ;;  %v1351_v13 = vpop.eup %1350 }
 0x739   :  { %1352 = vrcp.f32 %v513_v12 }
 0x746   :  { %v1353_v14 = vpop.eup %1352 }
 0x747   :  { %v516_v15 = vsel %vm1525_vm5, %v1351_v13, %v1353_v14 }
 0x748   :  { %519 = vrot.lane.b32.xlu0 %v516_v15, %s1398_s5  ;;  %v517_v18 = vmul.f32 %v516_v15, %v425_v60 }
 0x7ba   :  { %v520_v16 = vpop.permute.xlu0 %519 }
 0x7bb   :  { %v522_v17 = vmul.f32 %v520_v16, %v516_v15 }
 0x7bd   :  { %524 = vrot.lane.b32.xlu1 %v522_v17, %s1399_s26 }
 0x82f   :  { %v525_v19 = vpop.permute.xlu1 %524 }
 0x830   :  { %v527_v20 = vadd.f32 %v525_v19, %v517_v18 }
 0x832   :  { %1354 = vtanh.f32 %v527_v20 }
 0x83f   :  { %v1355_v21 = vpop.eup %1354 }
 0x840   :  { %530 = vrot.lane.b32.xlu0 %v1355_v21, %s1398_s5 }
 0x8b2   :  { %v531_v22 = vpop.permute.xlu0 %530 }
 0x8b3   :  { %v533_v23 = vmul.f32 %v531_v22, %v516_v15 }
 0x8b5   :  { %536 = vrot.lane.b32.xlu1 %v533_v23, %s1399_s26 }
 0x927   :  { %v537_v24 = vpop.permute.xlu1 %536 }
 0x928   :  { %1271 = vmatmul.mubr.msk.f32.vlgmr.msra.gmra.mxu0 %vm230_vm6, %v537_v24 }
 0x929   :  { %1285 = vmatpush3.msra.mxu0 %v1470_v8  ;;  %1292 = vmatprep.mubr.msk.f32.mxu0 %vm1397_vm1, %v1396_v7 }
 0x92a   :  { %1286 = vmatprep.subr.mxu0 %v1396_v7 }
 0x92b   :  { %1287 = vmatpush3.msra.mxu0 %v1475_v9 }
 0x92c   :  { %1288 = vmatprep.subr.mxu0 %v1396_v7 }
 0x92d   :  { %1289 = vmatpush3.msra.mxu0 %v1485_v10 }
 0x92e   :  { %1290 = vmatprep.subr.mxu0 %v1396_v7 }
 0x92f   :  { %1291 = vmatpush3.msra.mxu0 %v1492_v11 }
 0x930   :  { %1306 = vmatprep.subr.mxu0 %v1396_v7 }
 0x9e8   :  { %v606_v26 = vpop.f32.mrf.mxu0 }
 0x9e9   :  { %v610_v27 = vadd.f32 %v606_v26, %v534_v25 }
 0x9ea   :  { %v1272_v28 = vpop.f32.mrf.mxu0 }
 0x9eb   :  { %v1148_v29 = vmul.f32 -1.442695, %v610_v27 }
 0x9ed   :  { %1356 = vpow2.f32 %v1148_v29 }
 0x9ee   :  { %1358 = vtanh.f32 %v610_v27 }
 0x9fa   :  { %v1357_v30 = vpop.eup %1356 }
 0x9fb   :  { %v615_v31 = vadd.f32 1.0, %v1357_v30  ;;  %v1359_v32 = vpop.eup %1358 }
 0x9fd   :  { %1360 = vrcp.f32 %v615_v31 }
 0xa0a   :  { %v1361_v34 = vpop.eup %1360 }
 0xa0b   :  { %v618_v35 = vsel %vm1525_vm5, %v1359_v32, %v1361_v34 }
 0xa0c   :  { %621 = vrot.lane.b32.xlu0 %v618_v35, %s1398_s5  ;;  %v619_v38 = vmul.f32 %v618_v35, %v527_v20  ;;  %v840_v20 = vld [vmem:[#allocation2 + $0xc] sm:$0x3] }
 0xa7e   :  { %v622_v36 = vpop.permute.xlu0 %621 }
 0xa7f   :  { %v624_v37 = vmul.f32 %v622_v36, %v618_v35 }
 0xa81   :  { %626 = vrot.lane.b32.xlu1 %v624_v37, %s1399_s26 }
 0xaf3   :  { %v627_v39 = vpop.permute.xlu1 %626 }
 0xaf4   :  { %v629_v40 = vadd.f32 %v627_v39, %v619_v38 }
 0xaf6   :  { %1362 = vtanh.f32 %v629_v40 }
 0xb03   :  { %v1363_v41 = vpop.eup %1362 }
 0xb04   :  { %632 = vrot.lane.b32.xlu0 %v1363_v41, %s1398_s5 }
 0xb76   :  { %v633_v42 = vpop.permute.xlu0 %632 }
 0xb77   :  { %v635_v43 = vmul.f32 %v633_v42, %v618_v35 }
 0xb79   :  { %638 = vrot.lane.b32.xlu1 %v635_v43, %s1399_s26 }
 0xbeb   :  { %v639_v44 = vpop.permute.xlu1 %638 }
 0xbec   :  { %1282 = vmatmul.mubr.msk.f32.vlgmr.msra.gmra.mxu1 %vm230_vm6, %v639_v44 }
 0xbed   :  { %1296 = vmatpush3.msra.mxu1 %v1470_v8  ;;  %1303 = vmatprep.mubr.msk.f32.mxu1 %vm1397_vm1, %v1396_v7 }
 0xbee   :  { %1297 = vmatprep.subr.mxu1 %v1396_v7 }
 0xbef   :  { %1298 = vmatpush3.msra.mxu1 %v1475_v9 }
 0xbf0   :  { %1299 = vmatprep.subr.mxu1 %v1396_v7 }
 0xbf1   :  { %1300 = vmatpush3.msra.mxu1 %v1485_v10 }
 0xbf2   :  { %1301 = vmatprep.subr.mxu1 %v1396_v7 }
 0xbf3   :  { %1302 = vmatpush3.msra.mxu1 %v1492_v11 }
 0xbf4   :  { %1317 = vmatprep.subr.mxu1 %v1396_v7 }
 0xcac   :  { %v708_v46 = vpop.f32.mrf.mxu1 }
 0xcad   :  { %v712_v47 = vadd.f32 %v708_v46, %v636_v45 }
 0xcae   :  { %v1283_v48 = vpop.f32.mrf.mxu1 }
 0xcaf   :  { %v1150_v49 = vmul.f32 -1.442695, %v712_v47 }
 0xcb1   :  { %1364 = vpow2.f32 %v1150_v49 }
 0xcb2   :  { %1366 = vtanh.f32 %v712_v47 }
 0xcbe   :  { %v1365_v50 = vpop.eup %1364 }
 0xcbf   :  { %v717_v51 = vadd.f32 1.0, %v1365_v50  ;;  %v1367_v52 = vpop.eup %1366 }
 0xcc1   :  { %1368 = vrcp.f32 %v717_v51 }
 0xcce   :  { %v1369_v53 = vpop.eup %1368 }
 0xccf   :  { %v720_v54 = vsel %vm1525_vm5, %v1367_v52, %v1369_v53 }
 0xcd0   :  { %723 = vrot.lane.b32.xlu0 %v720_v54, %s1398_s5  ;;  %v721_v57 = vmul.f32 %v720_v54, %v629_v40  ;;  %v942_v40 = vld [vmem:[#allocation2 + $0xe] sm:$0x3] }
 0xd42   :  { %v724_v55 = vpop.permute.xlu0 %723 }
 0xd43   :  { %v726_v56 = vmul.f32 %v724_v55, %v720_v54  ;;  %v1047_v55 = vld [vmem:[%s1663_s6 + $0x18] sm:$0xff] }
 0xd45   :  { %728 = vrot.lane.b32.xlu1 %v726_v56, %s1399_s26  ;;  %v1046_v56 = vld [vmem:[%s1663_s6 + $0x10] sm:$0xff] }
 0xdb7   :  { %v729_v58 = vpop.permute.xlu1 %728 }
 0xdb8   :  { %v731_v59 = vadd.f32 %v729_v58, %v721_v57  ;;  %v1044_v57 = vld [vmem:[%s1663_s6] sm:$0xff] }
 0xdba   :  { %1370 = vtanh.f32 %v731_v59 }
 0xdc7   :  { %v1371_v60 = vpop.eup %1370 }
 0xdc8   :  { %734 = vrot.lane.b32.xlu0 %v1371_v60, %s1398_s5 }
 0xe3a   :  { %v735_v61 = vpop.permute.xlu0 %734 }
 0xe3b   :  { %v737_v62 = vmul.f32 %v735_v61, %v720_v54 }
 0xe3d   :  { %740 = vrot.lane.b32.xlu1 %v737_v62, %s1399_s26 }
 0xeaf   :  { %v741_v63 = vpop.permute.xlu1 %740 }
 0xeb0   :  { %1293 = vmatmul.mubr.msk.f32.vlgmr.msra.gmra.mxu0 %vm230_vm6, %v741_v63 }
 0xeb1   :  { %1307 = vmatpush3.msra.mxu0 %v1470_v8  ;;  %1314 = vmatprep.mubr.msk.f32.mxu0 %vm1397_vm1, %v1396_v7 }
 0xeb2   :  { %1308 = vmatprep.subr.mxu0 %v1396_v7 }
 0xeb3   :  { %1309 = vmatpush3.msra.mxu0 %v1475_v9 }
 0xeb4   :  { %1310 = vmatprep.subr.mxu0 %v1396_v7 }
 0xeb5   :  { %1311 = vmatpush3.msra.mxu0 %v1485_v10 }
 0xeb6   :  { %1312 = vmatprep.subr.mxu0 %v1396_v7 }
 0xeb7   :  { %1313 = vmatpush3.msra.mxu0 %v1492_v11 }
 0xf70   :  { %v810_v1 = vpop.f32.mrf.mxu0 }
 0xf71   :  { %v814_v2 = vadd.f32 %v810_v1, %v738_v0 }
 0xf72   :  { %v1294_v3 = vpop.f32.mrf.mxu0 }
 0xf73   :  { %v1152_v8 = vmul.f32 -1.442695, %v814_v2 }
 0xf75   :  { %1372 = vpow2.f32 %v1152_v8 }
 0xf76   :  { %1374 = vtanh.f32 %v814_v2 }
 0xf82   :  { %v1373_v4 = vpop.eup %1372 }
 0xf83   :  { %v819_v5 = vadd.f32 1.0, %v1373_v4  ;;  %v1375_v6 = vpop.eup %1374 }
 0xf85   :  { %1376 = vrcp.f32 %v819_v5 }
 0xf92   :  { %v1377_v9 = vpop.eup %1376 }
 0xf93   :  { %v822_v12 = vsel %vm1525_vm5, %v1375_v6, %v1377_v9 }
 0xf94   :  { %825 = vrot.lane.b32.xlu0 %v822_v12, %s1398_s5  ;;  %v823_v11 = vmul.f32 %v822_v12, %v731_v59  ;;  %v13_v59 = vstv %s1664_s7 }
 0xf95   :  { %14 = vst [vmem:[#allocation3] sm:$0x1] %v13_v59 }
 0xf9c   :  { %v1157_v63 = vld [vmem:[#allocation3] ss:$0 sm:$0xff] }
0x1006   :  { %v826_v10 = vpop.permute.xlu0 %825 }
0x1007   :  { %v828_v13 = vmul.f32 %v826_v10, %v822_v12 }
0x1009   :  { %830 = vrot.lane.b32.xlu1 %v828_v13, %s1399_s26 }
0x107b   :  { %v831_v14 = vpop.permute.xlu1 %830 }
0x107c   :  { %v833_v15 = vadd.f32 %v831_v14, %v823_v11 }
0x107e   :  { %1378 = vtanh.f32 %v833_v15 }
0x108b   :  { %v1379_v16 = vpop.eup %1378 }
0x108c   :  { %836 = vrot.lane.b32.xlu0 %v1379_v16, %s1398_s5 }
0x10fe   :  { %v837_v17 = vpop.permute.xlu0 %836 }
0x10ff   :  { %v839_v18 = vmul.f32 %v837_v17, %v822_v12 }
0x1101   :  { %842 = vrot.lane.b32.xlu1 %v839_v18, %s1399_s26 }
0x1173   :  { %v843_v19 = vpop.permute.xlu1 %842 }
0x1174   :  { %1304 = vmatmul.mubr.msk.f32.vlgmr.msra.gmra.mxu1 %vm230_vm6, %v843_v19 }
0x1175   :  { %1325 = vmatprep.mubr.msk.f32.mxu1 %vm1397_vm1, %v1396_v7  ;;  %1318 = vmatpush3.msra.mxu1 %v1047_v55 }
0x1176   :  { %1319 = vmatprep.subr.mxu1 %v1396_v7 }
0x1177   :  { %1320 = vmatpush3.msra.mxu1 %v1046_v56 }
0x1178   :  { %1321 = vmatprep.subr.mxu1 %v1396_v7 }
0x1179   :  { %1322 = vmatpush3.msra.mxu1 %v1045_v33 }
0x117a   :  { %1323 = vmatprep.subr.mxu1 %v1396_v7 }
0x117b   :  { %1324 = vmatpush3.msra.mxu1 %v1044_v57 }
0x1234   :  { %v912_v21 = vpop.f32.mrf.mxu1 }
0x1235   :  { %v916_v22 = vadd.f32 %v912_v21, %v840_v20 }
0x1236   :  { %v1305_v23 = vpop.f32.mrf.mxu1 }
0x1237   :  { %v1154_v24 = vmul.f32 -1.442695, %v916_v22 }
0x1239   :  { %1380 = vpow2.f32 %v1154_v24 }
0x123a   :  { %1382 = vtanh.f32 %v916_v22 }
0x1246   :  { %v1381_v25 = vpop.eup %1380 }
0x1247   :  { %v921_v26 = vadd.f32 1.0, %v1381_v25  ;;  %v1383_v27 = vpop.eup %1382 }
0x1249   :  { %1384 = vrcp.f32 %v921_v26 }
0x1256   :  { %v1385_v28 = vpop.eup %1384 }
0x1257   :  { %v924_v29 = vsel %vm1525_vm5, %v1383_v27, %v1385_v28 }
0x1258   :  { %927 = vrot.lane.b32.xlu0 %v924_v29, %s1398_s5  ;;  %v925_v32 = vmul.f32 %v924_v29, %v833_v15 }
0x12ca   :  { %v928_v30 = vpop.permute.xlu0 %927 }
0x12cb   :  { %v930_v31 = vmul.f32 %v928_v30, %v924_v29 }
0x12cd   :  { %932 = vrot.lane.b32.xlu1 %v930_v31, %s1399_s26 }
0x133f   :  { %v933_v34 = vpop.permute.xlu1 %932 }
0x1340   :  { %v935_v35 = vadd.f32 %v933_v34, %v925_v32 }
0x1342   :  { %1386 = vtanh.f32 %v935_v35 }
0x134f   :  { %v1387_v36 = vpop.eup %1386 }
0x1350   :  { %938 = vrot.lane.b32.xlu0 %v1387_v36, %s1398_s5 }
0x13c2   :  { %v939_v37 = vpop.permute.xlu0 %938 }
0x13c3   :  { %v941_v38 = vmul.f32 %v939_v37, %v924_v29 }
0x13c5   :  { %944 = vrot.lane.b32.xlu1 %v941_v38, %s1399_s26 }
0x1437   :  { %v945_v39 = vpop.permute.xlu1 %944 }
0x1438   :  { %1315 = vmatmul.mubr.msk.f32.vlgmr.msra.gmra.mxu0 %vm230_vm6, %v945_v39 }
0x14f8   :  { %v1014_v41 = vpop.f32.mrf.mxu0 }
0x14f9   :  { %v1018_v42 = vadd.f32 %v1014_v41, %v942_v40 }
0x14fa   :  { %v1316_v43 = vpop.f32.mrf.mxu0 }
0x14fb   :  { %v1156_v44 = vmul.f32 -1.442695, %v1018_v42 }
0x14fd   :  { %1388 = vpow2.f32 %v1156_v44 }
0x14fe   :  { %1390 = vtanh.f32 %v1018_v42 }
0x150a   :  { %v1389_v45 = vpop.eup %1388 }
0x150b   :  { %v1023_v46 = vadd.f32 1.0, %v1389_v45  ;;  %v1391_v47 = vpop.eup %1390 }
0x150d   :  { %1392 = vrcp.f32 %v1023_v46 }
0x151a   :  { %v1393_v48 = vpop.eup %1392 }
0x151b   :  { %v1026_v49 = vsel %vm1525_vm5, %v1391_v47, %v1393_v48 }
0x151c   :  { %1029 = vrot.lane.b32.xlu0 %v1026_v49, %s1398_s5  ;;  %v1027_v52 = vmul.f32 %v1026_v49, %v935_v35 }
0x158e   :  { %v1030_v50 = vpop.permute.xlu0 %1029 }
0x158f   :  { %v1032_v51 = vmul.f32 %v1030_v50, %v1026_v49 }
0x1591   :  { %1034 = vrot.lane.b32.xlu1 %v1032_v51, %s1399_s26 }
0x1603   :  { %v1035_v53 = vpop.permute.xlu1 %1034 }
0x1604   :  { %v1037_v54 = vadd.f32 %v1035_v53, %v1027_v52 }
0x1606   :  { %1394 = vtanh.f32 %v1037_v54 }
0x1613   :  { %v1395_v58 = vpop.eup %1394 }
0x1614   :  { %1040 = vrot.lane.b32.xlu0 %v1395_v58, %s1398_s5 }
0x1686   :  { %v1041_v60 = vpop.permute.xlu0 %1040 }
0x1687   :  { %v1043_v61 = vmul.f32 %v1041_v60, %v1026_v49 }
0x1689   :  { %1056 = vrot.lane.b32.xlu1 %v1043_v61, %s1399_s26 }
0x16fb   :  { %v1057_v62 = vpop.permute.xlu1 %1056 }
0x16fc   :  { %1326 = vmatmul.mubr.msk.f32.vlgmr.msra.gmra.mxu1 %vm230_vm6, %v1057_v62 }
0x17bc   :  { %v1126_v0 = vpop.f32.mrf.mxu1 }
0x17bd   :  { %v1127_v7 = vadd.f32 %v1157_v63, %v1126_v0 }
0x17be   :  { %v1327_v1 = vpop.f32.mrf.mxu1 }
0x17bf   :  { %1131 = vst.msk [vmem:[%s1665_s8] sm:$0x3] %vm1130_vm7, %v1127_v7 }

</bundles_post_ra>
